<compile_context>
chip_gen: v5e
topology: v5e:2x2
jax: 0.10.0
libtpu: 0.0.40
codegen_flags: <defaults>
</compile_context>

<pallas_src>
import functools

import jax
import jax.numpy as jnp
from jax.experimental import pallas as pl
from jax.experimental.pallas import tpu as pltpu


def _round_up(x, m):
    return ((x + m - 1) // m) * m


def _footprint_bytes(bb, tq, lp, dp, cbytes):
    """Rough per-grid-step VMEM footprint (bytes) used for tile selection."""
    f32 = 4
    x_in = 2 * bb * lp * dp * f32             # x block (keys/values), double buffered
    m_in = 2 * bb * lp * f32                  # mask block
    w_in = 2 * dp * dp * f32 + 2 * dp * f32   # W^T + bias
    out_b = 2 * bb * tq * dp * f32            # output block, double buffered
    xp_s = bb * lp * dp * cbytes              # projection scratch
    temps = (2 * bb * tq * lp * f32           # scores + e (f32)
             + bb * tq * lp * cbytes          # alpha in compute dtype
             + bb * lp * dp * (cbytes + f32)) # x cast + f32 projection temp
    return x_in + m_in + w_in + out_b + xp_s + temps


def _self_attn_match_kernel(x_ref, mask_ref, wt_ref, b_ref, out_ref, xp_ref, *,
                            diag: bool, compute_dtype):
    # x_ref (BB, Lp, Dp), mask_ref (BB, 1, Lp), wt_ref (Dp, Dp) [already W^T],
    # b_ref (1, Dp), out_ref (BB, TQ, Dp), xp_ref scratch (BB, Lp, Dp).
    BB, L, D = x_ref.shape
    TQ = out_ref.shape[1]
    qi = pl.program_id(1)

    # Projection once per batch block.  The q axis is "arbitrary" (sequential,
    # innermost), so q == 0 always runs before the q steps that reuse this
    # scratch for the same batch block.
    @pl.when(qi == 0)
    def _():
        x_c = x_ref[...].astype(compute_dtype)
        wt = wt_ref[...].astype(compute_dtype)           # (Dp, Dp) = W^T
        proj = jnp.dot(x_c.reshape(BB * L, D), wt,
                       preferred_element_type=jnp.float32)
        proj = proj + b_ref[...].astype(jnp.float32)
        xp_ref[...] = jnp.maximum(proj, 0.0).astype(compute_dtype).reshape(BB, L, D)

    xp_k = xp_ref[...]                                   # (BB, Lp, Dp) keys
    if TQ == L:
        q0 = 0
        xp_q = xp_k
    else:
        q0 = pl.multiple_of(qi * TQ, TQ)
        xp_q = xp_ref[:, pl.ds(q0, TQ), :]               # (BB, TQ, Dp) queries

    # NT-form batched matmul (contraction on the feature axis).
    # TODO(synk): confirm via pl.lower_as_mlir that no XLU transpose is inserted.
    scores = jnp.einsum("bqd,bkd->bqk", xp_q, xp_k,
                        preferred_element_type=jnp.float32)   # (BB, TQ, Lp) f32

    pad_mask = mask_ref[...] > 0.5                       # (BB, 1, Lp); broadcasts over q
    if diag:
        scores = jnp.where(pad_mask, -jnp.inf, scores)
    else:
        row = jax.lax.broadcasted_iota(jnp.int32, (TQ, L), 0) + q0
        col = jax.lax.broadcasted_iota(jnp.int32, (TQ, L), 1)
        scores = jnp.where(pad_mask, -jnp.inf,
                           jnp.where((row == col)[None, :, :], 0.0, scores))

    # Exact softmax over the full key axis, f32 path.  Fully-masked rows -> NaN,
    # like PyTorch.  Normalize + cast fused so raw/e/alpha don't all stay live.
    scores = scores - jnp.max(scores, axis=-1, keepdims=True)
    e = jnp.exp(scores)
    inv = pl.reciprocal(jnp.sum(e, axis=-1, keepdims=True), approx=True)
    alpha_c = (e * inv).astype(compute_dtype)

    # matched_seq = alpha @ x (attend over the ORIGINAL x).
    out = jnp.einsum("bqk,bkd->bqd", alpha_c,
                     x_ref[...].astype(compute_dtype),
                     preferred_element_type=jnp.float32)
    out_ref[...] = out.astype(out_ref.dtype)


def self_attn_match(x, x_mask, weight, bias, *, diag: bool = True,
                    block_b: int | None = None, block_q: int | None = None,
                    compute_dtype=jnp.bfloat16):
    """x: (B, L, D) f32; x_mask: (B, L) {0,1} (1 = padding); weight: (D, D); bias: (D,)."""
    B, L, D = x.shape
    cbytes = jnp.dtype(compute_dtype).itemsize

    # Generation-aware VMEM ceiling (128 MiB on v5e/v6e, 64 MiB on v7x).
    try:
        vmem_cap = int(pltpu.get_tpu_info().vmem_capacity_bytes)
    except Exception:
        vmem_cap = 64 * 2**20
    budget = int(0.45 * vmem_cap)

    # Query tile: MXU-friendly 256 default, multiple of 8 when it tiles L.
    if block_q is None:
        block_q = min(L, 256)
    if block_q < L:
        block_q = max(8, (block_q // 8) * 8)
    else:
        block_q = L

    # Lane-dense feature dim (unmasked vst on the output store).
    Dp = _round_up(D, 128)

    def fits(bb, bq):
        lp = _round_up(L, bq)
        return _footprint_bytes(bb, bq, lp, Dp, cbytes) <= budget

    # Batch tile: keep >=2 batch steps when auto (pipelining / dual-core on
    # v7x), then shrink block_b, then block_q, until the footprint fits.
    auto_bb = block_b is None
    if auto_bb:
        block_b = min(B, 8)
        if B >= 2:
            block_b = min(block_b, max(1, B // 2))
    block_b = max(1, min(block_b, B))
    while block_b > 1 and not fits(block_b, block_q):
        block_b = max(1, block_b // 2)
    while block_q > 8 and not fits(block_b, block_q):
        new_q = max(8, (block_q // 2 // 8) * 8)
        if new_q == block_q:
            break
        block_q = new_q

    Lp = _round_up(L, block_q)
    est = _footprint_bytes(block_b, block_q, Lp, Dp, cbytes)
    vmem_bytes = int(min(0.9 * vmem_cap, max(32 * 2**20, 2 * est)))

    pad_b = (-B) % block_b
    pad_l = Lp - L
    pad_d = Dp - D

    if pad_b or pad_l or pad_d:
        x = jnp.pad(x, ((0, pad_b), (0, pad_l), (0, pad_d)))
    if pad_l:
        # Padded sequence positions are marked as padding (mask=1) so they get
        # -inf scores and zero softmax weight for every real query row.
        x_mask = jnp.pad(x_mask, ((0, 0), (0, pad_l)), constant_values=1)
    if pad_b:
        # Padded batch rows use mask=0 / x=0: finite garbage, sliced off below.
        x_mask = jnp.pad(x_mask, ((0, pad_b), (0, 0)), constant_values=0)
    if pad_d:
        weight = jnp.pad(weight, ((0, pad_d), (0, pad_d)))
        bias = jnp.pad(bias, ((0, pad_d),))
    Bp = B + pad_b

    w_t = weight.T                                    # pre-transpose: kernel does x @ W^T directly
    mask_f = x_mask.astype(jnp.float32).reshape(Bp, 1, Lp)
    bias_2d = bias.reshape(1, Dp).astype(jnp.float32)

    kernel = functools.partial(_self_attn_match_kernel, diag=diag,
                               compute_dtype=compute_dtype)

    out = pl.pallas_call(
        kernel,
        out_shape=jax.ShapeDtypeStruct((Bp, Lp, Dp), x.dtype),
        grid_spec=pltpu.PrefetchScalarGridSpec(
            num_scalar_prefetch=0,
            grid=(Bp // block_b, Lp // block_q),
            in_specs=[
                # x (keys/values): index_map ignores q -> stays resident across q steps.
                pl.BlockSpec((block_b, Lp, Dp), lambda b, q: (b, 0, 0)),
                pl.BlockSpec((block_b, 1, Lp), lambda b, q: (b, 0, 0)),   # mask
                pl.BlockSpec((Dp, Dp), lambda b, q: (0, 0)),              # W^T (shared)
                pl.BlockSpec((1, Dp), lambda b, q: (0, 0)),               # bias (shared)
            ],
            out_specs=pl.BlockSpec((block_b, block_q, Dp), lambda b, q: (b, q, 0)),
            scratch_shapes=[pltpu.VMEM((block_b, Lp, Dp), compute_dtype)],
        ),
        compiler_params=pltpu.CompilerParams(
            dimension_semantics=("parallel", "arbitrary"),
            vmem_limit_bytes=vmem_bytes,
        ),
    )(x, mask_f, w_t, bias_2d)

    if pad_b or pad_l or pad_d:
        out = out[:B, :L, :D]
    return out


def _reference(x, x_mask, weight, bias, *, diag: bool = True):
    # Pure-JAX f32 reference of the PyTorch forward (for validation).
    x_proj = jax.nn.relu(jnp.einsum("bld,ed->ble", x, weight) + bias)
    scores = jnp.einsum("bld,bmd->blm", x_proj, x_proj)
    if not diag:
        L = x.shape[1]
        scores = scores * (1.0 - jnp.eye(L, dtype=x.dtype))
    mask = x_mask.astype(bool)[:, None, :]
    scores = jnp.where(mask, -jnp.inf, scores)
    alpha = jax.nn.softmax(scores, axis=2)
    return jnp.einsum("blm,bmd->bld", alpha, x)


if __name__ == "__main__":
    B, L, D = 2, 8, 32
    key = jax.random.PRNGKey(0)
    kx, kw, kb = jax.random.split(key, 3)

    x = jax.random.normal(kx, (B, L, D), dtype=jnp.float32)
    # 1 for padding, 0 for true tokens; last two positions of each row padded.
    x_mask = jnp.zeros((B, L), dtype=jnp.int32).at[:, L - 2:].set(1)

    # Deterministic nn.Linear(input_size, input_size) parameters (uniform init).
    bound = 1.0 / (D ** 0.5)
    weight = jax.random.uniform(kw, (D, D), jnp.float32, -bound, bound)
    bias = jax.random.uniform(kb, (D,), jnp.float32, -bound, bound)

    ref = _reference(x, x_mask, weight, bias, diag=True)

    # f32 MXU path: tight agreement (only approx-reciprocal differs from ref).
    out_f32 = jax.block_until_ready(
        self_attn_match(x, x_mask, weight, bias, diag=True,
                        compute_dtype=jnp.float32))
    assert out_f32.shape == (B, L, D)
    assert jnp.allclose(out_f32, ref, atol=5e-3, rtol=5e-3), "f32 mismatch vs reference"

    # Default bf16 MXU path: looser tolerance (bf16 operands, f32 accumulation).
    out_bf16 = jax.block_until_ready(
        self_attn_match(x, x_mask, weight, bias, diag=True))
    assert jnp.allclose(out_bf16, ref, atol=1e-1, rtol=1e-1), "bf16 mismatch vs reference"

    # Batch padding (B not divisible by block_b) + diag=False.
    B2 = 3
    x2 = jax.random.normal(jax.random.PRNGKey(1), (B2, L, D), dtype=jnp.float32)
    m2 = jnp.zeros((B2, L), dtype=jnp.int32).at[:, L - 1:].set(1)
    ref2 = _reference(x2, m2, weight, bias, diag=False)
    out2 = jax.block_until_ready(
        self_attn_match(x2, m2, weight, bias, diag=False, block_b=2,
                        compute_dtype=jnp.float32))
    assert out2.shape == (B2, L, D)
    assert jnp.allclose(out2, ref2, atol=5e-3, rtol=5e-3), "diag=False / batch padding mismatch"

    # Query tiling + sequence-length padding (L=12 -> Lp=16, block_q=8 -> 2 q steps).
    B3, L3 = 2, 12
    x3 = jax.random.normal(jax.random.PRNGKey(2), (B3, L3, D), dtype=jnp.float32)
    m3 = jnp.zeros((B3, L3), dtype=jnp.int32).at[:, L3 - 3:].set(1)
    ref3 = _reference(x3, m3, weight, bias, diag=False)
    out3 = jax.block_until_ready(
        self_attn_match(x3, m3, weight, bias, diag=False, block_q=8,
                        compute_dtype=jnp.float32))
    assert out3.shape == (B3, L3, D)
    assert jnp.allclose(out3, ref3, atol=5e-3, rtol=5e-3), "q-tiling / length padding mismatch"

    print("KERNEL_OK")
</pallas_src>

<mosaic_0001>
module attributes {stable_mosaic.version = 11 : i64} {
  func.func @_self_attn_match_kernel(%arg0: i32, %arg1: i32, %arg2: memref<1x8x128xf32, #tpu.memory_space<vmem>>, %arg3: memref<1x1x8xf32, #tpu.memory_space<vmem>>, %arg4: memref<128x128xf32, #tpu.memory_space<vmem>>, %arg5: memref<1x128xf32, #tpu.memory_space<vmem>>, %arg6: memref<1x8x128xf32, #tpu.memory_space<vmem>>, %arg7: memref<1x8x128xf32, #tpu.memory_space<vmem>>) attributes {dimension_semantics = [#tpu.dimension_semantics<parallel>, #tpu.dimension_semantics<arbitrary>], iteration_bounds = array<i64: 2, 1>, scalar_prefetch = 0 : i64, scratch_operands = 1 : i64, tpu.core_type = #tpu.core_type<tc>, window_params = [{transform_indices = @transform_0, window_bounds = array<i64: 1, 8, 128>}, {transform_indices = @transform_1, window_bounds = array<i64: 1, 1, 8>}, {pipeline_mode = #tpu.pipeline_mode<synchronous>, transform_indices = @transform_2, window_bounds = array<i64: 128, 128>}, {pipeline_mode = #tpu.pipeline_mode<synchronous>, transform_indices = @transform_3, window_bounds = array<i64: 1, 128>}, {transform_indices = @transform_4, window_bounds = array<i64: 1, 8, 128>}]} {
    %c0_i32 = arith.constant 0 : i32
    %0 = arith.cmpi eq, %arg1, %c0_i32 : i32
    %1 = arith.extui %0 : i1 to i32
    %c0_i32_0 = arith.constant 0 : i32
    %2 = arith.cmpi ne, %1, %c0_i32_0 : i32
    scf.if %2 {
      %c0_17 = arith.constant 0 : index
      %c0_18 = arith.constant 0 : index
      %c0_19 = arith.constant 0 : index
      %25 = vector.load %arg2[%c0_17, %c0_18, %c0_19] : memref<1x8x128xf32, #tpu.memory_space<vmem>>, vector<1x8x128xf32>
      %c0_20 = arith.constant 0 : index
      %c0_21 = arith.constant 0 : index
      %26 = vector.load %arg4[%c0_20, %c0_21] : memref<128x128xf32, #tpu.memory_space<vmem>>, vector<128x128xf32>
      %27 = vector.shape_cast %25 : vector<1x8x128xf32> to vector<8x128xf32>
      %cst_22 = arith.constant dense<0.000000e+00> : vector<8x128xf32>
      %28 = tpu.matmul %27, %26, %cst_22 {dimension_numbers = #tpu.dot_dimension_numbers<[1], [0], [0], [1], [0, 0, 1, 1], [], []>} : vector<8x128xf32>, vector<128x128xf32>, vector<8x128xf32> -> vector<8x128xf32>
      %c0_23 = arith.constant 0 : index
      %c0_24 = arith.constant 0 : index
      %29 = vector.load %arg5[%c0_23, %c0_24] : memref<1x128xf32, #tpu.memory_space<vmem>>, vector<1x128xf32>
      %30 = vector.broadcast %29 : vector<1x128xf32> to vector<8x128xf32>
      %31 = arith.addf %28, %30 : vector<8x128xf32>
      %cst_25 = arith.constant 0.000000e+00 : f32
      %32 = vector.broadcast %cst_25 : f32 to vector<8x128xf32>
      %33 = arith.maximumf %31, %32 : vector<8x128xf32>
      %34 = vector.shape_cast %33 : vector<8x128xf32> to vector<1x8x128xf32>
      %c0_26 = arith.constant 0 : index
      %c0_27 = arith.constant 0 : index
      %c0_28 = arith.constant 0 : index
      %35 = vector.load %arg7[%c0_26, %c0_27, %c0_28] : memref<1x8x128xf32, #tpu.memory_space<vmem>>, vector<1x8x128xf32>
      tpu.vector_store %arg7[%c0_26, %c0_27, %c0_28], %34 {strides = array<i32>} : memref<1x8x128xf32, #tpu.memory_space<vmem>>, vector<1x8x128xf32>,
    } else {
    }
    %c0 = arith.constant 0 : index
    %c0_1 = arith.constant 0 : index
    %c0_2 = arith.constant 0 : index
    %3 = vector.load %arg7[%c0, %c0_1, %c0_2] : memref<1x8x128xf32, #tpu.memory_space<vmem>>, vector<1x8x128xf32>
    "tpu.trace_start"() <{level = 10 : i32, message = "bqd,bkd->bqk"}> : () -> ()
    %cst = arith.constant dense<0.000000e+00> : vector<1x8x8xf32>
    %4 = tpu.matmul %3, %3, %cst {dimension_numbers = #tpu.dot_dimension_numbers<[2], [2], [1], [1], [0, 0, 0, 1, 1, 1], [0], [0]>} : vector<1x8x128xf32>, vector<1x8x128xf32>, vector<1x8x8xf32> -> vector<1x8x8xf32>
    "tpu.trace_stop"() : () -> ()
    %c0_3 = arith.constant 0 : index
    %c0_4 = arith.constant 0 : index
    %c0_5 = arith.constant 0 : index
    %5 = vector.load %arg3[%c0_3, %c0_4, %c0_5] : memref<1x1x8xf32, #tpu.memory_space<vmem>>, vector<1x1x8xf32>
    %cst_6 = arith.constant 5.000000e-01 : f32
    %6 = vector.broadcast %cst_6 : f32 to vector<1x1x8xf32>
    %7 = arith.cmpf ogt, %5, %6 : vector<1x1x8xf32>
    %cst_7 = arith.constant 0xFF800000 : f32
    %8 = vector.shape_cast %7 : vector<1x1x8xi1> to vector<1x1x8xi1>
    %9 = vector.broadcast %8 : vector<1x1x8xi1> to vector<1x8x8xi1>
    %10 = vector.broadcast %cst_7 : f32 to vector<1x8x8xf32>
    %11 = arith.select %9, %10, %4 : vector<1x8x8xi1>, vector<1x8x8xf32>
    %cst_8 = arith.constant dense<0xFF800000> : vector<1x8xf32>
    %12 = vector.multi_reduction <maximumf>, %11, %cst_8 [2] : vector<1x8x8xf32> to vector<1x8xf32>
    %13 = vector.shape_cast %12 : vector<1x8xf32> to vector<1x8x1xf32>
    %14 = vector.broadcast %13 : vector<1x8x1xf32> to vector<1x8x8xf32>
    %15 = arith.subf %11, %14 : vector<1x8x8xf32>
    %16 = math.exp %15 : vector<1x8x8xf32>
    %cst_9 = arith.constant dense<0.000000e+00> : vector<1x8xf32>
    %17 = vector.multi_reduction <add>, %16, %cst_9 [2] : vector<1x8x8xf32> to vector<1x8xf32>
    %18 = vector.shape_cast %17 : vector<1x8xf32> to vector<1x8x1xf32>
    %19 = tpu.reciprocal %18 {approx = true} : vector<1x8x1xf32> -> vector<1x8x1xf32>
    %20 = vector.broadcast %19 : vector<1x8x1xf32> to vector<1x8x8xf32>
    %21 = arith.mulf %16, %20 : vector<1x8x8xf32>
    %c0_10 = arith.constant 0 : index
    %c0_11 = arith.constant 0 : index
    %c0_12 = arith.constant 0 : index
    %22 = vector.load %arg2[%c0_10, %c0_11, %c0_12] : memref<1x8x128xf32, #tpu.memory_space<vmem>>, vector<1x8x128xf32>
    "tpu.trace_start"() <{level = 10 : i32, message = "bqk,bkd->bqd"}> : () -> ()
    %cst_13 = arith.constant dense<0.000000e+00> : vector<1x8x128xf32>
    %23 = tpu.matmul %21, %22, %cst_13 {dimension_numbers = #tpu.dot_dimension_numbers<[2], [1], [1], [2], [0, 0, 0, 1, 1, 2], [0], [0]>} : vector<1x8x8xf32>, vector<1x8x128xf32>, vector<1x8x128xf32> -> vector<1x8x128xf32>
    "tpu.trace_stop"() : () -> ()
    %c0_14 = arith.constant 0 : index
    %c0_15 = arith.constant 0 : index
    %c0_16 = arith.constant 0 : index
    %24 = vector.load %arg6[%c0_14, %c0_15, %c0_16] : memref<1x8x128xf32, #tpu.memory_space<vmem>>, vector<1x8x128xf32>
    tpu.vector_store %arg6[%c0_14, %c0_15, %c0_16], %23 {strides = array<i32>} : memref<1x8x128xf32, #tpu.memory_space<vmem>>, vector<1x8x128xf32>,
    return
  }
  func.func @transform_0(%arg0: i32, %arg1: i32) -> (i32, i32, i32) {
    %c0_i32 = arith.constant 0 : i32
    %c0_i32_0 = arith.constant 0 : i32
    %c0_i32_1 = arith.constant 0 : i32
    return %arg0, %c0_i32, %c0_i32_0 : i32, i32, i32
  }
  func.func @transform_1(%arg0: i32, %arg1: i32) -> (i32, i32, i32) {
    %c0_i32 = arith.constant 0 : i32
    %c0_i32_0 = arith.constant 0 : i32
    %c0_i32_1 = arith.constant 0 : i32
    return %arg0, %c0_i32, %c0_i32_0 : i32, i32, i32
  }
  func.func @transform_2(%arg0: i32, %arg1: i32) -> (i32, i32) {
    %c0_i32 = arith.constant 0 : i32
    %c0_i32_0 = arith.constant 0 : i32
    %c0_i32_1 = arith.constant 0 : i32
    return %c0_i32, %c0_i32_0 : i32, i32
  }
  func.func @transform_3(%arg0: i32, %arg1: i32) -> (i32, i32) {
    %c0_i32 = arith.constant 0 : i32
    %c0_i32_0 = arith.constant 0 : i32
    %c0_i32_1 = arith.constant 0 : i32
    return %c0_i32, %c0_i32_0 : i32, i32
  }
  func.func @transform_4(%arg0: i32, %arg1: i32) -> (i32, i32, i32) {
    %c0_i32 = arith.constant 0 : i32
    %c0_i32_0 = arith.constant 0 : i32
    return %arg0, %arg1, %c0_i32 : i32, i32, i32
  }
}

</mosaic_0001>

<bundles_post_ra>
// kernel: tpu_custom_call.1
= control target key start
LH: loop header
LB: loop body
LE: loop exit
PB: predicated region body
PF: predicated region fallthrough
CT: control target
= control target key end

     0   :  { %s994_s0 = inlined_call_operand.hbm [shape: f32[2,8,128], index: 0, kind: input, shape index: {}]   ;;  %s995_s1 = inlined_call_operand.hbm [shape: f32[2,1,8], index: 1, kind: input, shape index: {}]   ;;  %s996_s2 = inlined_call_operand.hbm [shape: f32[128,128], index: 2, kind: input, shape index: {}]   ;;  %s997_s3 = inlined_call_operand.vmem [shape: f32[1,128], index: 3, kind: input, shape index: {}]   ;;  %s998_s4 = inlined_call_operand.hbm [shape: f32[2,8,128], index: 4, kind: output, shape index: {}]  }
   0x1   :  { %1002 = sst [smem:[#allocation18_spill]] %s996_s2 }
   0x2   :  { %9 = vsyncpa [#allocation4], 0 }
   0x3   :  { %11 = vsyncpa [#allocation4 + $0x1], 0 }
   0x4   :  { %12 = vsyncpa [#allocation7], 0 }
   0x5   :  { %14 = vsyncpa [#allocation7 + $0x1], 0 }
   0x6   :  { %15 = vsyncpa [#allocation5], 0 }
   0x7   :  { %17 = vsyncpa [#allocation5 + $0x1], 0  ;;  %s828_s15 = smov 0   ;;  %s830_s16 = smov 0  }
   0x8   :  { %s832_s17 = smov 0   ;;  %s834_s18 = smov 0  }
   0x9   :  { %s836_s19 = smov 0   ;;  %s838_s20 = smov 0  }
   0xa LB: > { %1003 = sst [smem:[#allocation14_spill]] %s785_s17  ;;  %s859_s21 = sadd.s32 4294967295, %s797_s20   ;;  %s797_s20 = sphi %s838_s20, %s23_s20   ;;  %s793_s19 = sphi %s836_s19, %s1020_s19   ;;  %s789_s18 = sphi %s834_s18, %s1019_s18   ;;  %s785_s17 = sphi %s832_s17, %s1015_s17   ;;  %s781_s16 = sphi %s830_s16, %s1018_s16   ;;  %s777_s15 = sphi %s828_s15, %s1017_s15  }
   0xb   : > { %p517_p0 = scmp.ge.s32.totalorder %s797_s20, 1  ;;  %p56_p1 = scmp.eq.s32.totalorder %s859_s21, 0 }
   0xc   : > { %p162_p2 = scmp.lt.s32.totalorder %s797_s20, 3  ;;  %s1004_s2 = sld [smem:[#allocation18_spill]] }
   0xd   : > { %s799_s26 = smov [#allocation8]   ;;  %p519_p6 = scmp.ge.s32.totalorder %s797_s20, 2 }
   0xe   : > { %p867_p3 = pnand %p517_p0, %p162_p2  ;;  %s175_s27 = sshll.u32 %s799_s26, 4  ;;  %s176_s27 = int_to_ptr.vmem [resolvable:$true] %s175_s27 }
   0xf   : > { %s800_s28 = smov 128   ;;  %s801_s29 = smov 8  }
  0x10   : > { %p541_p4 = pneg %p867_p3  ;;  %s516_s30 = sadd.s32 4294967294, %s797_s20  }
  0x11   : > { %s35_s5 = sadd.s32 1, %s793_s19  ;;  %s42_s6 = sadd.s32 1, %s785_s17 }
  0x12   : > { %s173_s24 = sshll.u32 %s1004_s2, 4  ;;  %p542_p5 = pnand %p541_p4, %p56_p1  ;;  %s174_s24 = int_to_ptr.hbm [resolvable:$true] %s173_s24 }
  0x13   : > { %p37_p7 = scmp.ge.s32.totalorder %s35_s5, 2  ;;  %p49_p8 = scmp.ne.s32.totalorder %s785_s17, %s781_s16 }
  0x14   : > { %544 = dma.hbm_to_vmem [thread:$0]  (!%p542_p5), %s174_s24, 2048, %s176_s27, [#allocation7], %s800_s28, %s800_s28, %s801_s29  }
  0x15   : > { %p50_p9 = scmp.eq.s32.totalorder %s797_s20, 0  ;;  %p55_p10 = scmp.ne.s32.totalorder %s781_s16, %s777_s15 }
  0x16   : > { %s1022_s5 = smov (%p37_p7, %s35_s5), 0  ;;  %p149_p13 = scmp.eq.s32.totalorder %s859_s21, 1 }
  0x17   : > { %1006 = sst [smem:[#allocation15_spill]] %s1022_s5  ;;  %p886_p11 = por %p50_p9, %p49_p8 }
  0x18   : > { %p892_p12 = por %p56_p1, %p55_p10  ;;  %s39_s9 = ssub.s32 %s793_s19, %s1022_s5 }
  0x19   : > { %p40_p0 = scmp.eq.s32.totalorder %s39_s9, 0  ;;  %p155_p2 = scmp.eq.s32.totalorder %s516_s30, 1 }
  0x1a   : > { %p899_p4 = por %p149_p13, %p49_p8  ;;  %p557_p5 = scmp.lt.s32.totalorder %s797_s20, 2 }
  0x1b   : > { %s905_s11 = scalar_select %p40_p0, %s785_s17, %s42_s6  }
  0x1c   : > { %p907_p7 = por %p155_p2, %p55_p10  ;;  %s192_s13 = sand.u32 1, %s785_s17  }
  0x1d   : > { %1010 = sst [smem:[#allocation16_spill]] %s905_s11  ;;  %s520_s14 = sshll.u32 %s192_s13, 3 }
  0x1e   : > { %s1011_s12 = scalar_select %p907_p7, 1, 0 }
  0x1f   : > { %s521_s22 = sshll.u32 %s793_s19, 3  ;;  %s196_s27 = scalar_lea.vmem [#allocation3], %s520_s14 }
  0x20   : > { %1012 = sst [smem:[#allocation17_spill]] %s1011_s12  ;;  %s200_s26 = scalar_lea.hbm %s994_s0, %s521_s22 }
  0x21   : > { %s204_s28 = sshll.u32 %s196_s27, 4  ;;  %s202_s29 = sshll.u32 %s200_s26, 4  ;;  %s205_s28 = int_to_ptr.vmem [resolvable:$true] %s204_s28  ;;  %s203_s29 = int_to_ptr.hbm [resolvable:$true] %s202_s29 }
  0x22   : > { %p546_p8 = pnand %p557_p5, %p886_p11  ;;  %s211_s30 = sand.u32 1, %s797_s20  }
  0x23   : > { %s193_s6 = scalar_lea.sflag [#allocation4], %s192_s13  ;;  %s217_s5 = scalar_lea.hbm %s995_s1, %s793_s19 }
  0x24   : > { %548 = dma.hbm_to_vmem [thread:$0]  (!%p546_p8), %s203_s29, 128, %s205_s28, %s193_s6  }
  0x25   : > { %s214_s11 = scalar_lea.vmem [#allocation6], %s192_s13  ;;  %s219_s12 = sshll.u32 %s217_s5, 4  ;;  %s220_s12 = int_to_ptr.hbm [resolvable:$true] %s219_s12 }
  0x26   : > { %s221_s17 = sshll.u32 %s214_s11, 4  ;;  %s212_s22 = scalar_lea.sflag [#allocation7], %s211_s30  ;;  %s222_s17 = int_to_ptr.vmem [resolvable:$true] %s221_s17 }
  0x27   : > { %551 = dma.hbm_to_vmem [thread:$0]  (!%p546_p8), %s220_s12, 16, %s222_s17, %s212_s22  }
  0x28   : > { %230 = sbr.rel (%p867_p3) target bundleno = 732 (0x2dc), region = 36  ;;  %s926_s7 = sand.u32 (!%p867_p3), 1, %s781_s16  }
  0x29   : > { %s523_s14 = sshll.u32 (!%p867_p3), %s926_s7, 3  ;;  %s233_s2 = scalar_lea.sflag (!%p867_p3), [#allocation4], %s926_s7 }
  0x2a   : > { %s236_s13 = scalar_lea.vmem (!%p867_p3), [#allocation3], %s523_s14 }
  0x2d   : > { %760 = dma.done.wait (%p892_p12), %s233_s2, 128  }
  0x2e   : > { %762 = vsyncadd (%p892_p12), %s233_s2, 4294967168  ;;  %s242_s17 = sand.u32 1, %s859_s21   ;;  %s245_s5 = scalar_lea.vmem [#allocation6], %s926_s7 }
  0x2f   : > { %s243_s25 = scalar_lea.sflag [#allocation7], %s242_s17 }
  0x30   : > { %764 = dma.done.wait (%p892_p12), %s243_s25, 16  }
  0x31   : > { %766 = vsyncadd (%p892_p12), %s243_s25, 4294967280 }
  0x32   : > { %768 = dma.done.wait (%p56_p1), [#allocation7], 2048  }
  0x33   : > { %770 = vsyncadd (%p56_p1), [#allocation7], 4294965248  ;;  %v300_v0 = vld [vmem:[#allocation8 + $0x78] sm:$0xff]  ;;  %v299_v1 = vld [vmem:[#allocation8 + $0x70] sm:$0xff]  ;;  %v802_v22 = vmov 0   ;;  %vm354_vm2 = vcmask 64512  }
  0x34   : > { %305 = vmatpush.msra.mxu0 %v300_v0  ;;  %v298_v2 = vld [vmem:[#allocation8 + $0x68] sm:$0xff]  ;;  %v297_v3 = vld [vmem:[#allocation8 + $0x60] sm:$0xff]  ;;  %v296_v5 = vld [vmem:[#allocation8 + $0x58] sm:$0xff]  ;;  %s528_s11 = sshll.u32 %s789_s18, 3  ;;  %s279_s26 = scalar_lea.vmem [#allocation9], %s523_s14 }
  0x35   : > { %v284_v4 = vld [vmem:[%s236_s13] sm:$0xff]  ;;  %v293_v8 = vld [vmem:[#allocation8 + $0x40] sm:$0xff]  ;;  %s403_s24 = scalar_lea.hbm %s998_s4, %s528_s11  ;;  %s405_s27 = sshll.u32 %s279_s26, 4  ;;  %s406_s27 = int_to_ptr.vmem [resolvable:$true] %s405_s27 }
  0x36   : > { %306 = vmatpush.msra.mxu0 %v299_v1  ;;  %385 = vmatpush.msra.mxu2 %v284_v4  ;;  %v295_v6 = vld [vmem:[#allocation8 + $0x50] sm:$0xff]  ;;  %v294_v7 = vld [vmem:[#allocation8 + $0x48] sm:$0xff]  ;;  %v292_v9 = vld [vmem:[#allocation8 + $0x38] sm:$0xff]  ;;  %s407_s28 = sshll.u32 %s403_s24, 4  ;;  %s392_s29 = scalar_lea.sflag [#allocation5], %s926_s7  ;;  %s408_s28 = int_to_ptr.hbm [resolvable:$true] %s407_s28 }
  0x37   : > { %v291_v10 = vld [vmem:[#allocation8 + $0x30] sm:$0xff]  ;;  %v290_v11 = vld [vmem:[#allocation8 + $0x28] sm:$0xff]  ;;  %v289_v12 = vld [vmem:[#allocation8 + $0x20] sm:$0xff]  ;;  %s721_s30 = sshra.s32 %s408_s28, 4  ;;  %s727_s22 = scalar_lea.hbm %s998_s4, 16  ;;  %s722_s30 = int_to_ptr.hbm [resolvable:$true] %s721_s30 }
  0x38   : > { %307 = vmatpush.msra.mxu0 %v298_v2  ;;  %v288_v13 = vld [vmem:[#allocation8 + $0x18] sm:$0xff]  ;;  %v287_v14 = vld [vmem:[#allocation8 + $0x10] sm:$0xff]  ;;  %v286_v15 = vld [vmem:[#allocation8 + $0x8] sm:$0xff]  ;;  %s723_s6 = scalar_lea.hbm %s722_s30, 8  ;;  %p728_p10 = scmp.lt.s32.totalorder %s722_s30, %s998_s4 }
  0x39   : > { %v285_v16 = vld [vmem:[#allocation8] sm:$0xff]  ;;  %v612_v17 = vld [vmem:[%s997_s3] ss:$0 sm:$0xff]  ;;  %p724_p1 = scmp.ne.s32.totalorder %s722_s30, %s723_s6  ;;  %p729_p11 = scmp.lt.s32.totalorder %s727_s22, %s723_s6 }
  0x3a   : > { %308 = vmatpush.msra.mxu0 %v297_v3  ;;  %v348_v21 = vld [vmem:[%s245_s5] sm:$0x1] }
  0x3b   : > { %vm349_vm0 = vcmp.gt.f32.partialorder %v348_v21, 0.5  ;;  %p725_p3 = pnand %p724_p1, %p899_p4  ;;  %p730_p12 = por %p729_p11, %p728_p10 }
  0x3c   : > { %309 = vmatpush.msra.mxu0 %v296_v5  ;;  %v350_v23 = vsel %vm349_vm0, 1, %v802_v22 }
  0x3d   : > { %v351_v24 = vperm.slane %v350_v23, 0  ;;  %p726_p9 = pneg %p725_p3 }
  0x3e   : > { %310 = vmatpush.msra.mxu0 %v295_v6 }
  0x3f   : > { %vm352_vm1 = vcmp.eq.s32.totalorder %v351_v24, 1  ;;  %p731_p13 = pnand %p730_p12, %p726_p9 }
  0x40   : > { %311 = vmatpush.msra.mxu0 %v294_v7 }
  0x42   : > { %312 = vmatpush.msra.mxu0 %v293_v8 }
  0x44   : > { %313 = vmatpush.msra.mxu0 %v292_v9 }
  0x46   : > { %314 = vmatpush.msra.mxu0 %v291_v10 }
  0x48   : > { %315 = vmatpush.msra.mxu0 %v290_v11 }
  0x4a   : > { %316 = vmatpush.msra.mxu0 %v289_v12 }
  0x4c   : > { %317 = vmatpush.msra.mxu0 %v288_v13 }
  0x4e   : > { %318 = vmatpush.msra.mxu0 %v287_v14 }
  0x50   : > { %319 = vmatpush.msra.mxu0 %v286_v15 }
  0x52   : > { %320 = vmatpush.msra.mxu0 %v285_v16 }
  0x53   : > { %321 = vmatmul.f32.vlgmr.msra.gmra.mxu0 %v284_v4 }
  0xd0   : > { %v322_v18 = vpop.f32.mrf.mxu0 }
  0xd1   : > { %v323_v19 = vadd.f32 %v612_v17, %v322_v18 }
  0xd3   : > { %v325_v20 = vmax.f32 %v323_v19, 0.0 }
  0xd5   : > { %343 = vmatpush.xpose.msra.mxu1 %v325_v20 }
  0xd8   : > { %344 = vmatmul.f32.vlgmr.msra.gmra.mxu1 %v325_v20 }
 0x155   : > { %v345_v25 = vpop.f32.mrf.mxu1 }
 0x156   : > { %v353_v26 = vsel %vm352_vm1, -inf, %v345_v25 }
 0x157   : > { %v355_v27 = vsel %vm354_vm2, %v353_v26, -inf }
 0x158   : > { %356 = vmax.xlane.f32.xlu0 %v355_v27 }
 0x1cb   : > { %v357_v28 = vpop.xlane.xlu0 %356 }
 0x1cc   : > { %v358_v29 = vsub.f32 %v353_v26, %v357_v28 }
 0x1ce   : > { %v359_v30 = vmul.f32 1.442695, %v358_v29 }
 0x1d0   : > { %613 = vpow2.f32 %v359_v30 }
 0x1d6   : > { %v614_v31 = vpop.eup %613 }
 0x1d7   : > { %v361_v32 = vsel %vm354_vm2, %v614_v31, 0.0 }
 0x1d8   : > { %362 = vadd.xlane.f32.xlu0 %v361_v32 }
 0x24b   : > { %v363_v33 = vpop.xlane.xlu0 %362 }
 0x24c   : > { %615 = vrcp.f32 %v363_v33 }
 0x252   : > { %v616_v34 = vpop.eup %615 }
 0x253   : > { %v365_v35 = vmul.f32 %v616_v34, %v614_v31 }
 0x255   : > { %526 = vmatmul.msk.f32.vlgmr.msra.gmra.mxu2 %vm354_vm2, %v365_v35 }
 0x2d8   : > { %v387_v36 = vpop.f32.mrf.mxu2 }
 0x2d9   : > { %390 = vst [vmem:[%s279_s26] sm:$0xff] %v387_v36 }
 0x2da   : > { %734 = shalt.err (!%p731_p13)
}
 0x2db   : > { %539 = dma.vmem_to_hbm [thread:$0]  (%p899_p4), %s406_s27, 128, %s408_s28, %s392_s29  }
 0x2dc PF: > { %s419_s13 = sand.u32 1, %s777_s15   ;;  %p553_p0 = pnand %p519_p6, %p907_p7 }
 0x2dd   : > { %s420_s17 = scalar_lea.sflag [#allocation5], %s419_s13 }
 0x2de   : > { %p554_p2 = pneg %p553_p0 }
 0x2e0   : > { %772 = dma.done.wait (%p554_p2), %s420_s17, 128  }
 0x2e1   : > { %774 = vsyncadd (%p554_p2), %s420_s17, 4294967168  ;;  %s23_s20 = sadd.s32 1, %s797_s20   ;;  %s1014_s25 = sld [smem:[#allocation14_spill]] }
 0x2e2   : > { %p20_p5 = scmp.ge.s32.totalorder %s23_s20, 4   ;;  %s1015_s17 = sld [smem:[#allocation16_spill]] }
 0x2e3   : > { %s1016_s10 = sld [smem:[#allocation15_spill]]  ;;  %s1017_s15 = smov %s781_s16 }
 0x2e4   : > { %s1019_s18 = smov %s793_s19 }
 0x2e5   :  { %22 = sbr.rel (!%p20_p5) target bundleno = 10 (0xa), region = 102 }
 0x2e7   : > { %s1018_s16 = smov %s1014_s25 }
 0x2e9   : > { %s1020_s19 = smov %s1016_s10 }
 0x2ea   :  { %426 = vsyncpa [#allocation4], 1 }
 0x2eb   :  { %428 = vsyncpa [#allocation4 + $0x1], 1 }
 0x2ec   :  { %429 = vsyncpa [#allocation7], 1 }
 0x2ed   :  { %431 = vsyncpa [#allocation7 + $0x1], 1 }
 0x2ee   :  { %432 = vsyncpa [#allocation5], 1 }
 0x2ef   :  { %434 = vsyncpa [#allocation5 + $0x1], 1 }

</bundles_post_ra>
